<compile_context>
chip_gen: v5e
topology: v5e:2x2
jax: 0.10.0
libtpu: 0.0.40
codegen_flags: <defaults>
</compile_context>

<pallas_src>
import functools

import jax
import jax.numpy as jnp
from jax.experimental import pallas as pl
from jax.experimental.pallas import tpu as pltpu

_EPS = 1e-12  # F.normalize default eps


# ----------------------------------------------------------------------------
# helpers
# ----------------------------------------------------------------------------
def _l2_normalize_f32(x):
    """x / max(||x||, eps)  ==  x * rsqrt(max(||x||^2, eps^2)), in f32."""
    x = x.astype(jnp.float32)
    sq = jnp.sum(x * x, axis=-1, keepdims=True)
    return x * jax.lax.rsqrt(jnp.maximum(sq, jnp.float32(_EPS * _EPS)))


def _split_bf16(x_f32):
    """Split f32 into a bf16 (hi, lo) pair: hi + lo ~ x to ~16 mantissa bits."""
    hi = x_f32.astype(jnp.bfloat16)
    lo = (x_f32 - hi.astype(jnp.float32)).astype(jnp.bfloat16)
    return hi, lo


_NT_DIMS = (((1,), (1,)), ((), ()))  # (M, D) x (N, D) -> (M, N), contract D


def _bf16_dot_nt(a, b):
    # single-pass bf16 MXU matmul with f32 accumulation
    return jax.lax.dot_general(a, b, dimension_numbers=_NT_DIMS,
                               preferred_element_type=jnp.float32)


def _nt_matmul_3x(q_hi, q_lo, k_hi, k_lo):
    """bf16_3x (~f32-accurate) NT matmul: 3 single-pass bf16 MXU matmuls."""
    return (_bf16_dot_nt(q_hi, k_hi)
            + _bf16_dot_nt(q_hi, k_lo)
            + _bf16_dot_nt(q_lo, k_hi))


def _default_tile_q():
    # v5e (and older) MXU is 128x128: a 128-row tile keeps it fed and halves
    # the (tile, N) temporaries; v6e/v7x MXUs are 256x256 -> 256-row tiles.
    try:
        kind = jax.devices()[0].device_kind.lower()
        if ("v5" in kind) or ("v4" in kind) or ("v3" in kind) or ("v2" in kind):
            return 128
    except Exception:
        pass
    return 256


def _vmem_limit_bytes():
    # ~3/4 of physical VMEM: ~96 MiB on v5e/v6e (128 MiB), ~48 MiB on v7x (64 MiB).
    try:
        cap = int(pltpu.get_tpu_info().vmem_capacity_bytes)
    except Exception:
        cap = 128 * 1024 * 1024
    return max(32 * 1024 * 1024, min((cap * 3) // 4, 100 * 1024 * 1024))


# ----------------------------------------------------------------------------
# kernels
# ----------------------------------------------------------------------------
def _info_nce_self_kernel(q_ref, prow_ref, khi_ref, klo_ref, o_ref, *,
                          n_rows, inv_temperature):
    """negative_keys is None: logits = q_n @ p_n.T, labels = arange(N)."""
    i = pl.program_id(0)
    tile = q_ref.shape[0]

    row = jax.lax.broadcasted_iota(jnp.int32, (tile, 1), 0) + i * tile
    row_valid = row < n_rows                                  # (tile, 1)

    # Mask ragged-tile garbage rows BEFORE normalization (correctness invariant).
    q = jnp.where(row_valid, q_ref[...].astype(jnp.float32), 0.0)
    q_s = _l2_normalize_f32(q) * jnp.float32(inv_temperature)  # fold 1/T into q
    q_hi, q_lo = _split_bf16(q_s)

    # Positive logit from the row-aligned, pre-normalized positive tile (f32 VPU).
    pos = jnp.sum(q_s * prow_ref[...], axis=-1, keepdims=True)   # (tile, 1)

    # (tile, N) logits vs. the VMEM-resident, pre-normalized & pre-split keys.
    logits = _nt_matmul_3x(q_hi, q_lo, khi_ref[...], klo_ref[...])

    m = jnp.max(logits, axis=-1, keepdims=True)
    lse = m + jnp.log(jnp.sum(jnp.exp(logits - m), axis=-1, keepdims=True))

    o_ref[...] = jnp.where(row_valid, lse - pos, 0.0)             # per-row loss


def _info_nce_unpaired_kernel(q_ref, prow_ref, khi_ref, klo_ref, o_ref, *,
                              n_rows, inv_temperature):
    """unpaired negatives: logits = [q_n.p_n, q_n @ neg_n.T], labels = 0."""
    i = pl.program_id(0)
    tile = q_ref.shape[0]

    row = jax.lax.broadcasted_iota(jnp.int32, (tile, 1), 0) + i * tile
    row_valid = row < n_rows

    q = jnp.where(row_valid, q_ref[...].astype(jnp.float32), 0.0)
    q_s = _l2_normalize_f32(q) * jnp.float32(inv_temperature)
    q_hi, q_lo = _split_bf16(q_s)

    pos = jnp.sum(q_s * prow_ref[...], axis=-1, keepdims=True)    # (tile, 1)
    neg = _nt_matmul_3x(q_hi, q_lo, khi_ref[...], klo_ref[...])   # (tile, M)

    m = jnp.maximum(pos, jnp.max(neg, axis=-1, keepdims=True))
    lse = m + jnp.log(jnp.exp(pos - m) +
                      jnp.sum(jnp.exp(neg - m), axis=-1, keepdims=True))

    o_ref[...] = jnp.where(row_valid, lse - pos, 0.0)


# ----------------------------------------------------------------------------
# wrapper
# ----------------------------------------------------------------------------
def info_nce_loss(query, positive_key, negative_keys=None, *,
                  temperature=0.1, negative_mode="unpaired", tile_q=None):
    """Pallas-TPU InfoNCE forward (reduction='mean', symmetric_loss=False)."""
    if query.ndim != 2 or positive_key.ndim != 2:
        raise ValueError("<query> and <positive_key> must be 2-D.")
    n, d = query.shape
    if positive_key.shape != (n, d):
        raise ValueError("<query> and <positive_key> shape mismatch.")

    if tile_q is None:
        tile_q = _default_tile_q()
    # Query-row tile: full batch if it fits, else a sublane-aligned tile with a
    # cdiv grid and in-kernel masking of the ragged last tile (no pad copies).
    if n <= tile_q:
        tile = n
    else:
        tile = max(8, tile_q - (tile_q % 8))
    grid_n = pl.cdiv(n, tile)
    n_pad = grid_n * tile

    inv_t = 1.0 / float(temperature)

    # One-time key normalization + bf16 hi/lo split in the wrapper (the resident
    # key matrix is NOT re-normalized every grid step inside the kernel).
    pos_n = _l2_normalize_f32(positive_key)            # (n, d) f32

    compiler_params = pltpu.CompilerParams(
        dimension_semantics=("parallel",),             # no cross-step state
        vmem_limit_bytes=_vmem_limit_bytes(),
    )
    out_shape = jax.ShapeDtypeStruct((n_pad, 1), jnp.float32)
    out_spec = pl.BlockSpec((tile, 1), lambda i: (i, 0))
    q_spec = pl.BlockSpec((tile, d), lambda i: (i, 0))
    prow_spec = pl.BlockSpec((tile, d), lambda i: (i, 0))

    if negative_keys is None:
        key_hi, key_lo = _split_bf16(pos_n)            # resident keys, split once
        kernel = functools.partial(_info_nce_self_kernel,
                                   n_rows=n, inv_temperature=inv_t)
        key_rows = n
    else:
        if negative_mode != "unpaired" or negative_keys.ndim != 2:
            # TODO(synk): negative_mode='paired' (3-D negatives, per-sample bmm)
            # is not implemented as a Pallas kernel.
            raise NotImplementedError(
                "Only negative_mode='unpaired' with 2-D negative_keys is implemented.")
        m, d2 = negative_keys.shape
        if d2 != d:
            raise ValueError("<query> and <negative_keys> embedding dims differ.")
        neg_n = _l2_normalize_f32(negative_keys)
        key_hi, key_lo = _split_bf16(neg_n)
        kernel = functools.partial(_info_nce_unpaired_kernel,
                                   n_rows=n, inv_temperature=inv_t)
        key_rows = m

    per_row = pl.pallas_call(
        kernel,
        out_shape=out_shape,
        grid=(grid_n,),
        in_specs=[
            q_spec,                                          # query tile (streamed)
            prow_spec,                                       # row-aligned normalized pos
            pl.BlockSpec((key_rows, d), lambda i: (0, 0)),   # resident key hi (bf16)
            pl.BlockSpec((key_rows, d), lambda i: (0, 0)),   # resident key lo (bf16)
        ],
        out_specs=out_spec,
        compiler_params=compiler_params,
    )(query, pos_n, key_hi, key_lo)

    # Masked rows wrote 0, so summing the padded per-row losses is exact.
    # TODO(synk): symmetric_loss=True and reduction != 'mean' not implemented.
    return jnp.sum(per_row) / jnp.float32(n)


# ----------------------------------------------------------------------------
# pure-JAX reference + self-test
# ----------------------------------------------------------------------------
def _reference(query, positive_key, negative_keys=None, temperature=0.1):
    """Pure-JAX replica of the PyTorch info_nce (default settings)."""
    def nrm(x):
        norm = jnp.sqrt(jnp.sum(x * x, axis=-1, keepdims=True))
        return x / jnp.maximum(norm, _EPS)

    q = nrm(query)
    p = nrm(positive_key)
    if negative_keys is None:
        logits = jnp.matmul(q, p.T, precision="highest")
        labels = jnp.arange(q.shape[0])
    else:
        nk = nrm(negative_keys)
        pos = jnp.sum(q * p, axis=1, keepdims=True)
        neg = jnp.matmul(q, nk.T, precision="highest")
        logits = jnp.concatenate([pos, neg], axis=1)
        labels = jnp.zeros(q.shape[0], dtype=jnp.int32)
    logits = logits / temperature
    lse = jax.scipy.special.logsumexp(logits, axis=1)
    picked = jnp.take_along_axis(logits, labels[:, None], axis=1)[:, 0]
    return jnp.mean(lse - picked)


if __name__ == "__main__":
    key = jax.random.PRNGKey(0)
    k1, k2, k3, k4, k5, k6 = jax.random.split(key, 6)

    # Tolerance: kernel matmul is bf16_3x (~f32), reference is f32 HIGHEST.
    RTOL = ATOL = 2e-4

    # Docstring-style small example: batch=32, num_negative=48, embedding=128.
    batch, num_neg, dim = 32, 48, 128
    query = jax.random.normal(k1, (batch, dim), dtype=jnp.float32)
    positive = jax.random.normal(k2, (batch, dim), dtype=jnp.float32)
    negatives = jax.random.normal(k3, (num_neg, dim), dtype=jnp.float32)

    # Path 1: no negative keys (logits = q @ p.T, labels = arange).
    loss_self = jax.block_until_ready(info_nce_loss(query, positive))
    ref_self = _reference(query, positive, None)
    assert jnp.allclose(loss_self, ref_self, rtol=RTOL, atol=ATOL), (loss_self, ref_self)

    # Path 2: unpaired negative keys (labels = 0).
    loss_neg = jax.block_until_ready(info_nce_loss(query, positive, negatives))
    ref_neg = _reference(query, positive, negatives)
    assert jnp.allclose(loss_neg, ref_neg, rtol=RTOL, atol=ATOL), (loss_neg, ref_neg)

    # Tiled path: multiple grid steps + ragged last tile (300 rows, 128-row tiles).
    bq = jax.random.normal(k4, (300, 128), dtype=jnp.float32)
    bp = jax.random.normal(k5, (300, 128), dtype=jnp.float32)
    loss_big = jax.block_until_ready(info_nce_loss(bq, bp, tile_q=128))
    ref_big = _reference(bq, bp, None)
    assert jnp.allclose(loss_big, ref_big, rtol=RTOL, atol=ATOL), (loss_big, ref_big)

    # Tiled + ragged path with unpaired negatives.
    un = jax.random.normal(k6, (100, 128), dtype=jnp.float32)
    loss_un = jax.block_until_ready(info_nce_loss(bq, bp, un, tile_q=128))
    ref_un = _reference(bq, bp, un)
    assert jnp.allclose(loss_un, ref_un, rtol=RTOL, atol=ATOL), (loss_un, ref_un)

    print("KERNEL_OK")
</pallas_src>

<mosaic_0001>
module attributes {stable_mosaic.version = 11 : i64} {
  func.func @_info_nce_self_kernel(%arg0: i32, %arg1: memref<32x128xf32, #tpu.memory_space<vmem>>, %arg2: memref<32x128xf32, #tpu.memory_space<vmem>>, %arg3: memref<32x128xbf16, #tpu.memory_space<vmem>>, %arg4: memref<32x128xbf16, #tpu.memory_space<vmem>>, %arg5: memref<32x1xf32, #tpu.memory_space<vmem>>) attributes {dimension_semantics = [#tpu.dimension_semantics<parallel>], iteration_bounds = array<i64: 1>, scalar_prefetch = 0 : i64, scratch_operands = 0 : i64, tpu.core_type = #tpu.core_type<tc>, window_params = [{transform_indices = @transform_0, window_bounds = array<i64: 32, 128>}, {transform_indices = @transform_1, window_bounds = array<i64: 32, 128>}, {pipeline_mode = #tpu.pipeline_mode<synchronous>, transform_indices = @transform_2, window_bounds = array<i64: 32, 128>}, {pipeline_mode = #tpu.pipeline_mode<synchronous>, transform_indices = @transform_3, window_bounds = array<i64: 32, 128>}, {transform_indices = @transform_4, window_bounds = array<i64: 32, 1>}]} {
    %0 = tpu.iota {dimensions = array<i32: 0>} : vector<32x1xi32>
    %c32_i32 = arith.constant 32 : i32
    %1 = arith.muli %arg0, %c32_i32 : i32
    %2 = vector.broadcast %1 : i32 to vector<32x1xi32>
    %3 = arith.addi %0, %2 : vector<32x1xi32>
    %c32_i32_0 = arith.constant 32 : i32
    %4 = vector.broadcast %c32_i32_0 : i32 to vector<32x1xi32>
    %5 = arith.cmpi slt, %3, %4 : vector<32x1xi32>
    %c0 = arith.constant 0 : index
    %c0_1 = arith.constant 0 : index
    %6 = vector.load %arg1[%c0, %c0_1] : memref<32x128xf32, #tpu.memory_space<vmem>>, vector<32x128xf32>
    %cst = arith.constant 0.000000e+00 : f32
    %7 = vector.shape_cast %5 : vector<32x1xi1> to vector<32x1xi1>
    %8 = vector.broadcast %7 : vector<32x1xi1> to vector<32x128xi1>
    %9 = vector.broadcast %cst : f32 to vector<32x128xf32>
    %10 = arith.select %8, %6, %9 : vector<32x128xi1>, vector<32x128xf32>
    %11 = arith.mulf %10, %10 : vector<32x128xf32>
    %cst_2 = arith.constant dense<0.000000e+00> : vector<32xf32>
    %12 = vector.multi_reduction <add>, %11, %cst_2 [1] : vector<32x128xf32> to vector<32xf32>
    %13 = vector.shape_cast %12 : vector<32xf32> to vector<32x1xf32>
    %cst_3 = arith.constant 1.000000e-24 : f32
    %14 = vector.broadcast %cst_3 : f32 to vector<32x1xf32>
    %15 = arith.maximumf %13, %14 : vector<32x1xf32>
    %16 = math.rsqrt %15 : vector<32x1xf32>
    %17 = vector.broadcast %16 : vector<32x1xf32> to vector<32x128xf32>
    %18 = arith.mulf %10, %17 : vector<32x128xf32>
    %cst_4 = arith.constant 1.000000e+01 : f32
    %19 = vector.broadcast %cst_4 : f32 to vector<32x128xf32>
    %20 = arith.mulf %18, %19 : vector<32x128xf32>
    %21 = arith.truncf %20 : vector<32x128xf32> to vector<32x128xbf16>
    %22 = arith.extf %21 : vector<32x128xbf16> to vector<32x128xf32>
    %23 = arith.subf %20, %22 : vector<32x128xf32>
    %24 = arith.truncf %23 : vector<32x128xf32> to vector<32x128xbf16>
    %c0_5 = arith.constant 0 : index
    %c0_6 = arith.constant 0 : index
    %25 = vector.load %arg2[%c0_5, %c0_6] : memref<32x128xf32, #tpu.memory_space<vmem>>, vector<32x128xf32>
    %26 = arith.mulf %20, %25 : vector<32x128xf32>
    %cst_7 = arith.constant dense<0.000000e+00> : vector<32xf32>
    %27 = vector.multi_reduction <add>, %26, %cst_7 [1] : vector<32x128xf32> to vector<32xf32>
    %28 = vector.shape_cast %27 : vector<32xf32> to vector<32x1xf32>
    %c0_8 = arith.constant 0 : index
    %c0_9 = arith.constant 0 : index
    %29 = vector.load %arg3[%c0_8, %c0_9] : memref<32x128xbf16, #tpu.memory_space<vmem>>, vector<32x128xbf16>
    %c0_10 = arith.constant 0 : index
    %c0_11 = arith.constant 0 : index
    %30 = vector.load %arg4[%c0_10, %c0_11] : memref<32x128xbf16, #tpu.memory_space<vmem>>, vector<32x128xbf16>
    %cst_12 = arith.constant dense<0.000000e+00> : vector<32x32xf32>
    %31 = tpu.matmul %21, %29, %cst_12 {dimension_numbers = #tpu.dot_dimension_numbers<[1], [1], [0], [0], [0, 0, 1, 0], [], []>} : vector<32x128xbf16>, vector<32x128xbf16>, vector<32x32xf32> -> vector<32x32xf32>
    %cst_13 = arith.constant dense<0.000000e+00> : vector<32x32xf32>
    %32 = tpu.matmul %21, %30, %cst_13 {dimension_numbers = #tpu.dot_dimension_numbers<[1], [1], [0], [0], [0, 0, 1, 0], [], []>} : vector<32x128xbf16>, vector<32x128xbf16>, vector<32x32xf32> -> vector<32x32xf32>
    %33 = arith.addf %31, %32 : vector<32x32xf32>
    %cst_14 = arith.constant dense<0.000000e+00> : vector<32x32xf32>
    %34 = tpu.matmul %24, %29, %cst_14 {dimension_numbers = #tpu.dot_dimension_numbers<[1], [1], [0], [0], [0, 0, 1, 0], [], []>} : vector<32x128xbf16>, vector<32x128xbf16>, vector<32x32xf32> -> vector<32x32xf32>
    %35 = arith.addf %33, %34 : vector<32x32xf32>
    %cst_15 = arith.constant dense<0xFF800000> : vector<32xf32>
    %36 = vector.multi_reduction <maximumf>, %35, %cst_15 [1] : vector<32x32xf32> to vector<32xf32>
    %37 = vector.shape_cast %36 : vector<32xf32> to vector<32x1xf32>
    %38 = vector.broadcast %37 : vector<32x1xf32> to vector<32x32xf32>
    %39 = arith.subf %35, %38 : vector<32x32xf32>
    %40 = math.exp %39 : vector<32x32xf32>
    %cst_16 = arith.constant dense<0.000000e+00> : vector<32xf32>
    %41 = vector.multi_reduction <add>, %40, %cst_16 [1] : vector<32x32xf32> to vector<32xf32>
    %42 = vector.shape_cast %41 : vector<32xf32> to vector<32x1xf32>
    %43 = math.log %42 : vector<32x1xf32>
    %44 = arith.addf %37, %43 : vector<32x1xf32>
    %45 = arith.subf %44, %28 : vector<32x1xf32>
    %cst_17 = arith.constant 0.000000e+00 : f32
    %46 = vector.broadcast %cst_17 : f32 to vector<32x1xf32>
    %47 = arith.select %5, %45, %46 : vector<32x1xi1>, vector<32x1xf32>
    %c0_18 = arith.constant 0 : index
    %c0_19 = arith.constant 0 : index
    %48 = vector.load %arg5[%c0_18, %c0_19] : memref<32x1xf32, #tpu.memory_space<vmem>>, vector<32x1xf32>
    tpu.vector_store %arg5[%c0_18, %c0_19], %47 {strides = array<i32>} : memref<32x1xf32, #tpu.memory_space<vmem>>, vector<32x1xf32>,
    return
  }
  func.func @transform_0(%arg0: i32) -> (i32, i32) {
    %c0_i32 = arith.constant 0 : i32
    %c0_i32_0 = arith.constant 0 : i32
    return %arg0, %c0_i32 : i32, i32
  }
  func.func @transform_1(%arg0: i32) -> (i32, i32) {
    %c0_i32 = arith.constant 0 : i32
    %c0_i32_0 = arith.constant 0 : i32
    return %arg0, %c0_i32 : i32, i32
  }
  func.func @transform_2(%arg0: i32) -> (i32, i32) {
    %c0_i32 = arith.constant 0 : i32
    %c0_i32_0 = arith.constant 0 : i32
    %c0_i32_1 = arith.constant 0 : i32
    return %c0_i32, %c0_i32_0 : i32, i32
  }
  func.func @transform_3(%arg0: i32) -> (i32, i32) {
    %c0_i32 = arith.constant 0 : i32
    %c0_i32_0 = arith.constant 0 : i32
    %c0_i32_1 = arith.constant 0 : i32
    return %c0_i32, %c0_i32_0 : i32, i32
  }
  func.func @transform_4(%arg0: i32) -> (i32, i32) {
    %c0_i32 = arith.constant 0 : i32
    %c0_i32_0 = arith.constant 0 : i32
    return %arg0, %c0_i32 : i32, i32
  }
}

</mosaic_0001>

<bundles_post_ra>
// kernel: tpu_custom_call.1
= control target key start
LH: loop header
LB: loop body
LE: loop exit
PB: predicated region body
PF: predicated region fallthrough
CT: control target
= control target key end

     0   :  { %9 = vsyncpa [#allocation3], 0  ;;  %s650_s0 = inlined_call_operand.hbm [shape: f32[32,128], index: 0, kind: input, shape index: {}]   ;;  %s651_s1 = inlined_call_operand.hbm [shape: f32[32,128], index: 1, kind: input, shape index: {}]   ;;  %s652_s2 = inlined_call_operand.hbm [shape: bf16[32,128], index: 2, kind: input, shape index: {}]   ;;  %s653_s3 = inlined_call_operand.hbm [shape: bf16[32,128], index: 3, kind: input, shape index: {}]   ;;  %s654_s4 = inlined_call_operand.vmem [shape: f32[32,1], index: 4, kind: output, shape index: {}]  }
   0x1   :  { %10 = vsyncpa [#allocation5], 0 }
   0x2   :  { %11 = vsyncpa [#allocation8], 0  ;;  %s29_s17 = sshll.u32 %s651_s1, 4  ;;  %s536_s18 = smov [#allocation4]   ;;  %s30_s17 = int_to_ptr.hbm [resolvable:$true] %s29_s17 }
   0x3   :  { %s31_s19 = sshll.u32 %s536_s18, 4  ;;  %s16_s22 = sshll.u32 %s650_s0, 4  ;;  %s32_s19 = int_to_ptr.vmem [resolvable:$true] %s31_s19  ;;  %s17_s22 = int_to_ptr.hbm [resolvable:$true] %s16_s22 }
   0x4   :  { %s537_s23 = smov 128   ;;  %s538_s24 = smov 8  }
   0x5   :  { %37 = dma.hbm_to_vmem [thread:$0]  %s30_s17, 512, %s32_s19, [#allocation5], %s537_s23, %s537_s23, %s538_s24  }
   0x6   :  { %s539_s25 = smov [#allocation2]   ;;  %s42_s29 = sshll.u32 %s652_s2, 4  ;;  %s43_s29 = int_to_ptr.hbm [resolvable:$true] %s42_s29 }
   0x7   :  { %s18_s26 = sshll.u32 %s539_s25, 4  ;;  %s540_s1 = smov [#allocation6]   ;;  %s19_s26 = int_to_ptr.vmem [resolvable:$true] %s18_s26 }
   0x8   :  { %24 = dma.hbm_to_vmem [thread:$0]  %s17_s22, 512, %s19_s26, [#allocation3], %s537_s23, %s537_s23, %s538_s24  }
   0x9   :  { %s44_s30 = sshll.u32 %s540_s1, 4  ;;  %s55_s0 = sshll.u32 %s653_s3, 4  ;;  %s45_s30 = int_to_ptr.vmem [resolvable:$true] %s44_s30  ;;  %s56_s0 = int_to_ptr.hbm [resolvable:$true] %s55_s0 }
   0xa   :  { %s541_s7 = smov 64   ;;  %s542_s8 = smov 4  }
   0xb   :  { %50 = dma.hbm_to_vmem [thread:$0]  %s43_s29, 256, %s45_s30, [#allocation5], %s541_s7, %s541_s7, %s542_s8  }
   0xc   :  { %s543_s9 = smov [#allocation7]  }
   0xd   :  { %s57_s10 = sshll.u32 %s543_s9, 4  ;;  %s58_s10 = int_to_ptr.vmem [resolvable:$true] %s57_s10 }
   0xe   :  { %63 = dma.hbm_to_vmem [thread:$0]  %s56_s0, 256, %s58_s10, [#allocation8], %s541_s7, %s541_s7, %s542_s8  }
   0xf   :  { %530 = dma.done.wait [#allocation3], 512  }
  0x10   :  { %531 = vsyncadd [#allocation3], 4294966784 }
  0x11   :  { %532 = dma.done.wait [#allocation5], 768  }
  0x12   :  { %533 = vsyncadd [#allocation5], 4294966528 }
  0x13   :  { %534 = dma.done.wait [#allocation8], 256  }
  0x14   :  { %535 = vsyncadd [#allocation8], 4294967040  ;;  %v581_v0 = vld [vmem:[#allocation2 + $0x10] sm:$0xff]  ;;  %v96_v1 = vld [vmem:[#allocation2] sm:$0xff]  ;;  %vm311_vm12 = vcmask 261120   ;;  %vm368_vm13 = vcmask 7168  }
  0x15   :  { %v114_v2 = vmul.f32 %v581_v0, %v581_v0  ;;  %v112_v3 = vmul.f32 %v96_v1, %v96_v1  ;;  %v585_v4 = vld [vmem:[#allocation2 + $0x18] sm:$0xff]  ;;  %v587_v5 = vld [vmem:[#allocation2 + $0x8] sm:$0xff]  ;;  %v398_v10 = vld [vmem:[#allocation7] sm:$0xff] }
  0x16   :  { %v115_v6 = vmul.f32 %v585_v4, %v585_v4  ;;  %v113_v7 = vmul.f32 %v587_v5, %v587_v5  ;;  %v399_v8 = vld [vmem:[#allocation7 + $0x8] sm:$0xff]  ;;  %v397_v9 = vld [vmem:[#allocation6 + $0x8] sm:$0xff]  ;;  %v396_v11 = vld [vmem:[#allocation6] sm:$0xff] }
  0x17   :  { %120 = vadd.xlane.f32.xlu1 %v114_v2  ;;  %116 = vadd.xlane.f32.xlu0 %v112_v3 }
  0x18   :  { %244 = vmatpush.bf16.xpose.msra.mxu0 %v399_v8  ;;  %400 = vmatpush.bf16.xpose.msra.mxu3 %v399_v8 }
  0x19   :  { %275 = vmatpush.bf16.xpose.msra.mxu1 %v397_v9  ;;  %294 = vmatpush.bf16.xpose.msra.mxu2 %v397_v9 }
  0x1f   :  { %122 = vadd.xlane.f32.xlu1 %v115_v6  ;;  %118 = vadd.xlane.f32.xlu0 %v113_v7 }
  0x20   :  { %245 = vmatpush.bf16.xpose.msra.mxu0 %v398_v10  ;;  %401 = vmatpush.bf16.xpose.msra.mxu3 %v398_v10 }
  0x21   :  { %276 = vmatpush.bf16.xpose.msra.mxu1 %v396_v11  ;;  %295 = vmatpush.bf16.xpose.msra.mxu2 %v396_v11 }
  0x8a   :  { %v121_v12 = vpop.xlane.xlu1 %120  ;;  %v117_v13 = vpop.xlane.xlu0 %116 }
  0x8b   :  { %v126_v14 = vmax.f32 %v121_v12, 1e-24  ;;  %v124_v15 = vmax.f32 %v117_v13, 1e-24 }
  0x8d   :  { %410 = vrsqrt.f32 %v126_v14  ;;  %vm154_vm0 = vweird.f32 %v126_v14  ;;  %vm134_vm4 = vweird.f32 %v124_v15 }
  0x8e   :  { %412 = vrsqrt.f32 %v124_v15 }
  0x92   :  { %v123_v16 = vpop.xlane.xlu1 %122  ;;  %v119_v17 = vpop.xlane.xlu0 %118 }
  0x93   :  { %v411_v18 = vpop.eup %410  ;;  %v127_v19 = vmax.f32 %v123_v16, 1e-24  ;;  %v125_v20 = vmax.f32 %v119_v17, 1e-24 }
  0x94   :  { %v413_v21 = vpop.eup %412  ;;  %v149_v22 = vmul.f32 %v411_v18, %v126_v14  ;;  %vm155_vm1 = vweird.f32 %v411_v18 }
  0x95   :  { %v129_v23 = vmul.f32 %v413_v21, %v124_v15  ;;  %414 = vrsqrt.f32 %v127_v19  ;;  %vm593_vm2 = vmor %vm154_vm0, %vm155_vm1  ;;  %vm135_vm3 = vweird.f32 %v413_v21  ;;  %vm164_vm6 = vweird.f32 %v127_v19 }
  0x96   :  { %v150_v24 = vmul.f32 %v411_v18, %v149_v22  ;;  %416 = vrsqrt.f32 %v125_v20  ;;  %vm136_vm5 = vmor %vm134_vm4, %vm135_vm3  ;;  %vm144_vm10 = vweird.f32 %v125_v20 }
  0x97   :  { %v130_v25 = vmul.f32 %v413_v21, %v129_v23 }
  0x98   :  { %v151_v26 = vmul.f32 0.5, %v150_v24 }
  0x99   :  { %v131_v27 = vmul.f32 0.5, %v130_v25 }
  0x9a   :  { %v152_v28 = vsub.f32 1.5, %v151_v26 }
  0x9b   :  { %v415_v29 = vpop.eup %414  ;;  %v132_v31 = vsub.f32 1.5, %v131_v27 }
  0x9c   :  { %v417_v32 = vpop.eup %416  ;;  %v153_v33 = vmul.f32 %v411_v18, %v152_v28  ;;  %v159_v34 = vmul.f32 %v415_v29, %v127_v19  ;;  %vm165_vm7 = vweird.f32 %v415_v29 }
  0x9d   :  { %v133_v35 = vmul.f32 %v413_v21, %v132_v31  ;;  %v139_v36 = vmul.f32 %v417_v32, %v125_v20  ;;  %vm166_vm8 = vmor %vm164_vm6, %vm165_vm7  ;;  %vm145_vm9 = vweird.f32 %v417_v32 }
  0x9e   :  { %v157_v37 = vsel %vm593_vm2, %v411_v18, %v153_v33  ;;  %v160_v38 = vmul.f32 %v415_v29, %v159_v34  ;;  %vm146_vm11 = vmor %vm144_vm10, %vm145_vm9 }
  0x9f   :  { %v137_v39 = vsel %vm136_vm5, %v413_v21, %v133_v35  ;;  %v140_v40 = vmul.f32 %v417_v32, %v139_v36  ;;  %v170_v43 = vmul.f32 %v157_v37, %v581_v0 }
  0xa0   :  { %v168_v41 = vmul.f32 %v137_v39, %v96_v1  ;;  %v161_v42 = vmul.f32 0.5, %v160_v38 }
  0xa1   :  { %v141_v44 = vmul.f32 0.5, %v140_v40  ;;  %v602_v49 = vmul.f32 10.0, %v170_v43 }
  0xa2   :  { %v162_v45 = vsub.f32 1.5, %v161_v42  ;;  %v600_v47 = vmul.f32 10.0, %v168_v41 }
  0xa3   :  { %v142_v46 = vsub.f32 1.5, %v141_v44  ;;  %v178_v57 = vpack.c.bf16 %v602_v49, %v602_v49 }
  0xa4   :  { %v163_v48 = vmul.f32 %v415_v29, %v162_v45  ;;  %v176_v55 = vpack.c.bf16 %v600_v47, %v600_v47 }
  0xa5   :  { %v143_v50 = vmul.f32 %v417_v32, %v142_v46  ;;  %v220_v62 = vunpack.c.l.b16 %v178_v57  ;;  %v182_v9 = vunpack.c.l.bf16 %v178_v57 }
  0xa6   :  { %v167_v51 = vsel %vm166_vm8, %v415_v29, %v163_v48  ;;  %v180_v61 = vunpack.c.l.bf16 %v176_v55  ;;  %v218_v0 = vunpack.c.l.b16 %v176_v55 }
  0xa7   :  { %v171_v52 = vmul.f32 %v167_v51, %v585_v4  ;;  %v147_v53 = vsel %vm146_vm11, %v417_v32, %v143_v50  ;;  %v186_v11 = vsub.f32 %v602_v49, %v182_v9 }
  0xa8   :  { %v169_v54 = vmul.f32 %v147_v53, %v587_v5  ;;  %v184_v5 = vsub.f32 %v600_v47, %v180_v61  ;;  %v190_v53 = vld [vmem:[#allocation4] sm:$0xff]  ;;  %v193_v61 = vld [vmem:[#allocation4 + $0x18] sm:$0xff] }
  0xa9   :  { %v608_v56 = vmul.f32 10.0, %v171_v52 }
  0xaa   :  { %v612_v58 = vmul.f32 10.0, %v169_v54 }
  0xab   :  { %v179_v59 = vpack.c.bf16 %v608_v56, %v608_v56 }
  0xac   :  { %v177_v60 = vpack.c.bf16 %v612_v58, %v612_v58 }
  0xad   :  { %v221_v63 = vunpack.c.l.b16 %v179_v59  ;;  %v183_v8 = vunpack.c.l.bf16 %v179_v59  ;;  %v194_v59 = vmul.f32 %v190_v53, %v600_v47 }
  0xae   :  { %v219_v1 = vunpack.c.l.b16 %v177_v60  ;;  %v181_v2 = vunpack.c.l.bf16 %v177_v60 }
  0xaf   :  { %v223_v3 = vpack.c.b16 %v221_v63, %v220_v62  ;;  %v187_v10 = vsub.f32 %v608_v56, %v183_v8  ;;  %v191_v62 = vld [vmem:[#allocation4 + $0x8] sm:$0xff] }
  0xb0   :  { %v222_v4 = vpack.c.b16 %v219_v1, %v218_v0  ;;  %v185_v6 = vsub.f32 %v612_v58, %v181_v2  ;;  %v197_v0 = vmul.f32 %v193_v61, %v608_v56  ;;  %v195_v1 = vmul.f32 %v191_v62, %v612_v58 }
  0xb1   :  { %251 = vmatmul.bf16.vlgmr.msra.gmra.mxu3 %v223_v3  ;;  %v189_v12 = vpack.c.bf16 %v187_v10, %v186_v11 }
  0xb2   :  { %246 = vmatmul.bf16.vlgmr.msra.gmra.mxu0 %v222_v4  ;;  %277 = vmatmul.bf16.vlgmr.msra.gmra.mxu1 %v222_v4  ;;  %v188_v7 = vpack.c.bf16 %v185_v6, %v184_v5 }
  0xb4   :  { %296 = vmatmul.bf16.vlgmr.msra.gmra.mxu2 %v188_v7 }
  0xc2   :  { %282 = vmatmul.bf16.gmra.mxu1 %v223_v3  ;;  %v192_v3 = vld [vmem:[#allocation4 + $0x10] sm:$0xff] }
  0xc3   :  { %v196_v47 = vmul.f32 %v192_v3, %v602_v49 }
  0xc4   :  { %301 = vmatmul.bf16.gmra.mxu2 %v189_v12 }
 0x12f   :  { %v278_v13 = vpop.f32.mrf.mxu1  ;;  %v247_v14 = vpop.f32.mrf.mxu0 }
 0x130   :  { %v279_v15 = vadd.f32 %v278_v13, %v247_v14 }
 0x134   :  { %v252_v26 = vpop.f32.mrf.mxu3 }
 0x137   :  { %v280_v16 = vpop.f32.mrf.mxu1  ;;  %v297_v17 = vpop.f32.mrf.mxu2 }
 0x138   :  { %v307_v18 = vadd.f32 %v297_v17, %v279_v15  ;;  %v249_v20 = vpop.f32.mrf.mxu0 }
 0x139   :  { %v281_v21 = vadd.f32 %v280_v16, %v249_v20 }
 0x13a   :  { %v312_v19 = vsel %vm311_vm12, %v307_v18, -inf }
 0x13b   :  { %313 = vmax.xlane.f32.xlu2 %v312_v19 }
 0x13c   :  { %v254_v32 = vpop.f32.mrf.mxu3 }
 0x13f   :  { %v299_v22 = vpop.f32.mrf.mxu2  ;;  %v283_v24 = vpop.f32.mrf.mxu1 }
 0x140   :  { %v308_v23 = vadd.f32 %v299_v22, %v281_v21  ;;  %v284_v27 = vadd.f32 %v283_v24, %v252_v26 }
 0x142   :  { %v315_v25 = vsel %vm311_vm12, %v308_v23, -inf }
 0x143   :  { %316 = vmax.xlane.f32.xlu2 %v315_v25 }
 0x147   :  { %v302_v28 = vpop.f32.mrf.mxu2  ;;  %v285_v31 = vpop.f32.mrf.mxu1 }
 0x148   :  { %v309_v29 = vadd.f32 %v302_v28, %v284_v27  ;;  %v286_v33 = vadd.f32 %v285_v31, %v254_v32 }
 0x14a   :  { %v318_v30 = vsel %vm311_vm12, %v309_v29, -inf }
 0x14b   :  { %319 = vmax.xlane.f32.xlu0 %v318_v30 }
 0x14f   :  { %v304_v34 = vpop.f32.mrf.mxu2 }
 0x150   :  { %v310_v35 = vadd.f32 %v304_v34, %v286_v33 }
 0x152   :  { %v321_v36 = vsel %vm311_vm12, %v310_v35, -inf }
 0x153   :  { %322 = vmax.xlane.f32.xlu1 %v321_v36 }
 0x1ae   :  { %v314_v37 = vpop.xlane.xlu2 %313 }
 0x1af   :  { %v324_v38 = vsub.f32 %v307_v18, %v314_v37 }
 0x1b1   :  { %v328_v39 = vmul.f32 1.442695, %v324_v38 }
 0x1b3   :  { %418 = vpow2.f32 %v328_v39 }
 0x1b6   :  { %v317_v40 = vpop.xlane.xlu2 %316 }
 0x1b7   :  { %v325_v41 = vsub.f32 %v308_v23, %v317_v40 }
 0x1b9   :  { %v419_v42 = vpop.eup %418  ;;  %v330_v43 = vmul.f32 1.442695, %v325_v41 }
 0x1ba   :  { %v336_v44 = vsel %vm311_vm12, %v419_v42, 0.0 }
 0x1bb   :  { %420 = vpow2.f32 %v330_v43  ;;  %337 = vadd.xlane.f32.xlu2 %v336_v44 }
 0x1be   :  { %v320_v45 = vpop.xlane.xlu0 %319 }
 0x1bf   :  { %v326_v46 = vsub.f32 %v309_v29, %v320_v45 }
 0x1c1   :  { %v421_v48 = vpop.eup %420  ;;  %v332_v50 = vmul.f32 1.442695, %v326_v46 }
 0x1c2   :  { %v339_v51 = vsel %vm311_vm12, %v421_v48, 0.0 }
 0x1c3   :  { %422 = vpow2.f32 %v332_v50  ;;  %340 = vadd.xlane.f32.xlu0 %v339_v51 }
 0x1c6   :  { %v323_v52 = vpop.xlane.xlu1 %322 }
 0x1c7   :  { %v327_v54 = vsub.f32 %v310_v35, %v323_v52 }
 0x1c9   :  { %v423_v55 = vpop.eup %422  ;;  %v334_v57 = vmul.f32 1.442695, %v327_v54 }
 0x1ca   :  { %v342_v60 = vsel %vm311_vm12, %v423_v55, 0.0 }
 0x1cb   :  { %424 = vpow2.f32 %v334_v57  ;;  %198 = vadd.xlane.f32.xlu0 %v194_v59  ;;  %343 = vadd.xlane.f32.xlu1 %v342_v60 }
 0x1d1   :  { %v425_v63 = vpop.eup %424 }
 0x1d2   :  { %v345_v2 = vsel %vm311_vm12, %v425_v63, 0.0 }
 0x1d3   :  { %204 = vadd.xlane.f32.xlu0 %v197_v0  ;;  %200 = vadd.xlane.f32.xlu1 %v195_v1 }
 0x1d4   :  { %346 = vadd.xlane.f32.xlu2 %v345_v2 }
 0x1dc   :  { %202 = vadd.xlane.f32.xlu2 %v196_v47 }
 0x22e   :  { %v338_v4 = vpop.xlane.xlu2 %337 }
 0x22f   :  { %426 = vlog2.f32 %v338_v4 }
 0x235   :  { %v427_v5 = vpop.eup %426 }
 0x236   :  { %v341_v6 = vpop.xlane.xlu0 %340  ;;  %v349_v7 = vmul.f32 0.6931472, %v427_v5 }
 0x237   :  { %428 = vlog2.f32 %v341_v6 }
 0x238   :  { %v356_v8 = vadd.f32 %v349_v7, %v314_v37 }
 0x23d   :  { %v429_v9 = vpop.eup %428 }
 0x23e   :  { %v199_v56 = vpop.xlane.xlu0 %198  ;;  %v344_v58 = vpop.xlane.xlu1 %343  ;;  %v351_v11 = vmul.f32 0.6931472, %v429_v9 }
 0x23f   :  { %v360_v10 = vsub.f32 %v356_v8, %v199_v56  ;;  %430 = vlog2.f32 %v344_v58 }
 0x240   :  { %v357_v49 = vadd.f32 %v351_v11, %v317_v40 }
 0x241   :  { %369 = vst.msk [vmem:[%s654_s4] sm:$0xff] %vm368_vm13, %v360_v10 }
 0x245   :  { %v431_v13 = vpop.eup %430 }
 0x246   :  { %v201_v12 = vpop.xlane.xlu1 %200  ;;  %v353_v16 = vmul.f32 0.6931472, %v431_v13  ;;  %v205_v23 = vpop.xlane.xlu0 %204 }
 0x247   :  { %v347_v14 = vpop.xlane.xlu2 %346  ;;  %v361_v15 = vsub.f32 %v357_v49, %v201_v12 }
 0x248   :  { %432 = vlog2.f32 %v347_v14  ;;  %v358_v18 = vadd.f32 %v353_v16, %v320_v45 }
 0x249   :  { %370 = vst.msk [vmem:[%s654_s4 + $0x8] sm:$0xff] %vm368_vm13, %v361_v15 }
 0x24e   :  { %v433_v17 = vpop.eup %432 }
 0x24f   :  { %v355_v19 = vmul.f32 0.6931472, %v433_v17  ;;  %v203_v20 = vpop.xlane.xlu2 %202 }
 0x250   :  { %v362_v21 = vsub.f32 %v358_v18, %v203_v20 }
 0x251   :  { %v359_v22 = vadd.f32 %v355_v19, %v323_v52 }
 0x252   :  { %371 = vst.msk [vmem:[%s654_s4 + $0x10] sm:$0xff] %vm368_vm13, %v362_v21 }
 0x253   :  { %v363_v24 = vsub.f32 %v359_v22, %v205_v23 }
 0x255   :  { %372 = vst.msk [vmem:[%s654_s4 + $0x18] sm:$0xff] %vm368_vm13, %v363_v24 }
 0x256   :  { %377 = vsyncpa [#allocation3], 1 }
 0x257   :  { %378 = vsyncpa [#allocation5], 1 }
 0x258   :  { %379 = vsyncpa [#allocation8], 1 }

</bundles_post_ra>
